<compile_context>
chip_gen: v6e
topology: v6e:2x2x1
jax: 0.10.0
libtpu: 0.0.40
codegen_flags: <defaults>
</compile_context>

<pallas_src>
import functools

import jax
import jax.numpy as jnp
from jax.experimental import pallas as pl
from jax.experimental.pallas import tpu as pltpu


def _proj_head_kernel(x_ref, w1_ref, b1_ref, w2_ref, b2_ref, o_ref):
    # x_ref: (C, ts) f32 spatial tile (lanes = spatial); weights are VMEM-resident.
    h = jnp.dot(w1_ref[...], x_ref[...], preferred_element_type=jnp.float32)
    h = jnp.maximum(h + b1_ref[...], 0.0)

    y = jnp.dot(w2_ref[...], h, preferred_element_type=jnp.float32) + b2_ref[...]

    # F.normalize(p=2, dim=channel): channels sit on the sublane axis (axis 0).
    # Clamping ||y|| at 1e-12 == clamping sum(y^2) at 1e-24; rsqrt uses the EUP slot.
    sumsq = jnp.sum(y * y, axis=0, keepdims=True)
    inv = jax.lax.rsqrt(jnp.maximum(sumsq, 1e-24))
    o_ref[...] = (y * inv).astype(o_ref.dtype)


def _chip_budgets():
    """Returns (vmem_limit_cap_bytes, multi_tensorcore) for the local TPU generation."""
    try:
        info = pltpu.get_tpu_info()
        vmem_cap = int(getattr(info, "vmem_capacity_bytes", 64 << 20))
    except Exception:  # conservative fallback: treat like v7x (64 MiB / 2 TCs)
        vmem_cap = 64 << 20
    multi_tc = vmem_cap <= (96 << 20)           # v7x: 64 MiB per TC, 2 TCs per chip
    limit_cap = (44 << 20) if multi_tc else (100 << 20)
    return limit_cap, multi_tc


@functools.partial(jax.jit, static_argnames=("ts", "out_dtype"))
def projection_head_forward(x_nchw, w1_eff, b1_eff, w2, b2, *, ts=None,
                            out_dtype=jnp.float32):
    """x_nchw: (N, C, H, W) float32; BN pre-folded params.  Returns (N, P, H, W)."""
    n, c, hh, ww = x_nchw.shape
    p = w2.shape[0]
    s = hh * ww

    vmem_cap_limit, multi_tc = _chip_budgets()

    # Spatial tile on the lane axis: as large as the VMEM budget allows, multiple of 128.
    s128 = pl.cdiv(s, 128) * 128
    if ts is None:
        per_col = 16 * (c + p) * 4              # dbl-buffered io + intermediates + slack
        ts_cap = (vmem_cap_limit * 3 // 4) // per_col
        ts_cap = min(ts_cap, 16384 if multi_tc else 32768)
        ts_cap = max(128, (ts_cap // 128) * 128)
    else:
        ts_cap = max(128, (int(ts) // 128) * 128)

    n_tiles = max(1, pl.cdiv(s128, ts_cap))
    # v7x only: make sure both TensorCores get work on tiny batches.
    if multi_tc and n * n_tiles < 2 and s128 >= 256:
        n_tiles = 2
    ts_eff = pl.cdiv(pl.cdiv(s128, n_tiles), 128) * 128
    s_pad = n_tiles * ts_eff

    x3 = x_nchw.reshape(n, c, s)
    if s_pad != s:
        # Zero-padded spatial columns stay finite through the normalize and are sliced off.
        x3 = jnp.pad(x3, ((0, 0), (0, 0), (0, s_pad - s)))

    w1f = w1_eff.astype(jnp.float32)
    b1f = b1_eff.astype(jnp.float32)
    w2f = w2.astype(jnp.float32)
    b2f = b2.astype(jnp.float32)

    # VMEM budget sized from the actual tiles (+ headroom); floored at the v5e scoped
    # default, capped per generation (v7x has only 64 MiB physical per TensorCore).
    bytes_io = 2 * ts_eff * 4 * (c + p)          # double-buffered x / out tiles
    bytes_interm = ts_eff * 4 * (c + 2 * p)      # h, y, normalized y
    bytes_w = 4 * (c * c + c + p * c + p)
    vmem_limit = int(min(max(bytes_io + bytes_interm + bytes_w + (6 << 20),
                             16 << 20), vmem_cap_limit))

    out = pl.pallas_call(
        _proj_head_kernel,
        out_shape=jax.ShapeDtypeStruct((n, p, s_pad), out_dtype),
        grid_spec=pltpu.PrefetchScalarGridSpec(
            num_scalar_prefetch=0,
            grid=(n, n_tiles),
            in_specs=[
                pl.BlockSpec((None, c, ts_eff), lambda i, j: (i, 0, j)),
                pl.BlockSpec((c, c), lambda i, j: (0, 0)),   # weights: constant index map
                pl.BlockSpec((c, 1), lambda i, j: (0, 0)),
                pl.BlockSpec((p, c), lambda i, j: (0, 0)),
                pl.BlockSpec((p, 1), lambda i, j: (0, 0)),
            ],
            out_specs=pl.BlockSpec((None, p, ts_eff), lambda i, j: (i, 0, j)),
        ),
        compiler_params=pltpu.CompilerParams(
            dimension_semantics=("parallel", "parallel"),
            vmem_limit_bytes=vmem_limit),
    )(x3, w1f, b1f, w2f, b2f)

    if s_pad != s:
        out = out[:, :, :s]
    return out.reshape(n, p, hh, ww)


def make_params(key, dim_in, proj_dim):
    """Deterministic synthetic parameters matching the PyTorch module shapes (BN folded)."""
    ks = jax.random.split(key, 8)
    # Conv2d(dim_in, dim_in, 1): weight (out, in), bias (out,)
    w1 = jax.random.normal(ks[0], (dim_in, dim_in), jnp.float32) * 0.1
    b1 = jax.random.normal(ks[1], (dim_in,), jnp.float32) * 0.1
    # BatchNorm2d(dim_in): gamma, beta, running_mean, running_var (eval mode)
    gamma = 1.0 + 0.1 * jax.random.normal(ks[2], (dim_in,), jnp.float32)
    beta = 0.1 * jax.random.normal(ks[3], (dim_in,), jnp.float32)
    run_mean = 0.1 * jax.random.normal(ks[4], (dim_in,), jnp.float32)
    run_var = jnp.abs(jax.random.normal(ks[5], (dim_in,), jnp.float32)) + 0.5
    # Conv2d(dim_in, proj_dim, 1): weight (out, in), bias (out,)
    w2 = jax.random.normal(ks[6], (proj_dim, dim_in), jnp.float32) * 0.1
    b2 = jax.random.normal(ks[7], (proj_dim,), jnp.float32) * 0.1

    eps = 1e-5
    scale = gamma / jnp.sqrt(run_var + eps)      # per conv1 output channel
    # Fold eval-mode BN into conv1:  bn(W1 x + b1) = (scale*W1) x + (scale*b1 + beta - scale*mean)
    w1_eff = w1 * scale[:, None]                              # (C_out, C_in)
    b1_eff = (scale * b1 + beta - scale * run_mean)[:, None]  # (C, 1)
    b2c = b2[:, None]                                         # (P, 1)
    return w1_eff, b1_eff, w2, b2c


def reference_forward(x_nchw, w1_eff, b1_eff, w2, b2):
    """Pure f32, highest-precision reference of the module's forward (eval-mode BN)."""
    n, c, hh, ww = x_nchw.shape
    p = w2.shape[0]
    hi = jax.lax.Precision.HIGHEST
    x = x_nchw.reshape(n, c, hh * ww)
    h = jnp.maximum(jnp.einsum("oc,ncs->nos", w1_eff, x, precision=hi) + b1_eff[None], 0.0)
    y = jnp.einsum("pc,ncs->nps", w2, h, precision=hi) + b2[None]
    y = y / jnp.maximum(jnp.linalg.norm(y, axis=1, keepdims=True), 1e-12)
    return y.reshape(n, p, hh, ww)


if __name__ == "__main__":
    N, C, H, W = 2, 32, 16, 16
    PROJ = 64

    key = jax.random.PRNGKey(0)
    kx, kp = jax.random.split(key)
    x = jax.random.normal(kx, (N, C, H, W), jnp.float32)
    w1_eff, b1_eff, w2, b2 = make_params(kp, C, PROJ)

    out = projection_head_forward(x, w1_eff, b1_eff, w2, b2)
    out = jax.block_until_ready(out)

    ref = reference_forward(x, w1_eff, b1_eff, w2, b2)
    assert out.shape == (N, PROJ, H, W)
    assert bool(jnp.all(jnp.isfinite(out)))
    # f32 kernel (default TPU matmul precision) vs full-HIGHEST f32 reference on
    # unit-norm outputs; comfortably within tolerance.
    assert jnp.allclose(out, ref, atol=2e-2, rtol=2e-2), "mismatch vs reference"

    print("KERNEL_OK")
</pallas_src>

<mosaic_0001>
module attributes {stable_mosaic.version = 11 : i64} {
  func.func @_proj_head_kernel(%arg0: i32, %arg1: i32, %arg2: memref<1x32x256xf32, #tpu.memory_space<vmem>>, %arg3: memref<32x32xf32, #tpu.memory_space<vmem>>, %arg4: memref<32x1xf32, #tpu.memory_space<vmem>>, %arg5: memref<64x32xf32, #tpu.memory_space<vmem>>, %arg6: memref<64x1xf32, #tpu.memory_space<vmem>>, %arg7: memref<1x64x256xf32, #tpu.memory_space<vmem>>) attributes {dimension_semantics = [#tpu.dimension_semantics<parallel>, #tpu.dimension_semantics<parallel>], iteration_bounds = array<i64: 2, 1>, scalar_prefetch = 0 : i64, scratch_operands = 0 : i64, tpu.core_type = #tpu.core_type<tc>, window_params = [{transform_indices = @transform_0, window_bounds = array<i64: 1, 32, 256>}, {pipeline_mode = #tpu.pipeline_mode<synchronous>, transform_indices = @transform_1, window_bounds = array<i64: 32, 32>}, {pipeline_mode = #tpu.pipeline_mode<synchronous>, transform_indices = @transform_2, window_bounds = array<i64: 32, 1>}, {pipeline_mode = #tpu.pipeline_mode<synchronous>, transform_indices = @transform_3, window_bounds = array<i64: 64, 32>}, {pipeline_mode = #tpu.pipeline_mode<synchronous>, transform_indices = @transform_4, window_bounds = array<i64: 64, 1>}, {transform_indices = @transform_5, window_bounds = array<i64: 1, 64, 256>}]} {
    %c0 = arith.constant 0 : index
    %c0_0 = arith.constant 0 : index
    %0 = vector.load %arg3[%c0, %c0_0] : memref<32x32xf32, #tpu.memory_space<vmem>>, vector<32x32xf32>
    %c0_1 = arith.constant 0 : index
    %c0_2 = arith.constant 0 : index
    %c0_3 = arith.constant 0 : index
    %1 = vector.load %arg2[%c0_1, %c0_2, %c0_3] : memref<1x32x256xf32, #tpu.memory_space<vmem>>, vector<1x32x256xf32>
    %2 = vector.shape_cast %1 : vector<1x32x256xf32> to vector<32x256xf32>
    %cst = arith.constant dense<0.000000e+00> : vector<32x256xf32>
    %3 = tpu.matmul %0, %2, %cst {dimension_numbers = #tpu.dot_dimension_numbers<[1], [0], [0], [1], [0, 0, 1, 1], [], []>} : vector<32x32xf32>, vector<32x256xf32>, vector<32x256xf32> -> vector<32x256xf32>
    %c0_4 = arith.constant 0 : index
    %c0_5 = arith.constant 0 : index
    %4 = vector.load %arg4[%c0_4, %c0_5] : memref<32x1xf32, #tpu.memory_space<vmem>>, vector<32x1xf32>
    %5 = vector.broadcast %4 : vector<32x1xf32> to vector<32x256xf32>
    %6 = arith.addf %3, %5 : vector<32x256xf32>
    %cst_6 = arith.constant 0.000000e+00 : f32
    %7 = vector.broadcast %cst_6 : f32 to vector<32x256xf32>
    %8 = arith.maximumf %6, %7 : vector<32x256xf32>
    %c0_7 = arith.constant 0 : index
    %c0_8 = arith.constant 0 : index
    %9 = vector.load %arg5[%c0_7, %c0_8] : memref<64x32xf32, #tpu.memory_space<vmem>>, vector<64x32xf32>
    %cst_9 = arith.constant dense<0.000000e+00> : vector<64x256xf32>
    %10 = tpu.matmul %9, %8, %cst_9 {dimension_numbers = #tpu.dot_dimension_numbers<[1], [0], [0], [1], [0, 0, 1, 1], [], []>} : vector<64x32xf32>, vector<32x256xf32>, vector<64x256xf32> -> vector<64x256xf32>
    %c0_10 = arith.constant 0 : index
    %c0_11 = arith.constant 0 : index
    %11 = vector.load %arg6[%c0_10, %c0_11] : memref<64x1xf32, #tpu.memory_space<vmem>>, vector<64x1xf32>
    %12 = vector.broadcast %11 : vector<64x1xf32> to vector<64x256xf32>
    %13 = arith.addf %10, %12 : vector<64x256xf32>
    %14 = arith.mulf %13, %13 : vector<64x256xf32>
    %cst_12 = arith.constant dense<0.000000e+00> : vector<256xf32>
    %15 = vector.multi_reduction <add>, %14, %cst_12 [0] : vector<64x256xf32> to vector<256xf32>
    %16 = vector.shape_cast %15 : vector<256xf32> to vector<1x256xf32>
    %cst_13 = arith.constant 1.000000e-24 : f32
    %17 = vector.broadcast %cst_13 : f32 to vector<1x256xf32>
    %18 = arith.maximumf %16, %17 : vector<1x256xf32>
    %19 = math.rsqrt %18 : vector<1x256xf32>
    %20 = vector.broadcast %19 : vector<1x256xf32> to vector<64x256xf32>
    %21 = arith.mulf %13, %20 : vector<64x256xf32>
    %c0_14 = arith.constant 0 : index
    %c0_15 = arith.constant 0 : index
    %c0_16 = arith.constant 0 : index
    %22 = vector.load %arg7[%c0_14, %c0_15, %c0_16] : memref<1x64x256xf32, #tpu.memory_space<vmem>>, vector<1x64x256xf32>
    %23 = vector.shape_cast %22 : vector<1x64x256xf32> to vector<64x256xf32>
    %24 = vector.shape_cast %21 : vector<64x256xf32> to vector<1x64x256xf32>
    tpu.vector_store %arg7[%c0_14, %c0_15, %c0_16], %24 {strides = array<i32>} : memref<1x64x256xf32, #tpu.memory_space<vmem>>, vector<1x64x256xf32>,
    return
  }
  func.func @transform_0(%arg0: i32, %arg1: i32) -> (i32, i32, i32) {
    %c0_i32 = arith.constant 0 : i32
    %c0_i32_0 = arith.constant 0 : i32
    return %arg0, %c0_i32, %arg1 : i32, i32, i32
  }
  func.func @transform_1(%arg0: i32, %arg1: i32) -> (i32, i32) {
    %c0_i32 = arith.constant 0 : i32
    %c0_i32_0 = arith.constant 0 : i32
    %c0_i32_1 = arith.constant 0 : i32
    return %c0_i32, %c0_i32_0 : i32, i32
  }
  func.func @transform_2(%arg0: i32, %arg1: i32) -> (i32, i32) {
    %c0_i32 = arith.constant 0 : i32
    %c0_i32_0 = arith.constant 0 : i32
    %c0_i32_1 = arith.constant 0 : i32
    return %c0_i32, %c0_i32_0 : i32, i32
  }
  func.func @transform_3(%arg0: i32, %arg1: i32) -> (i32, i32) {
    %c0_i32 = arith.constant 0 : i32
    %c0_i32_0 = arith.constant 0 : i32
    %c0_i32_1 = arith.constant 0 : i32
    return %c0_i32, %c0_i32_0 : i32, i32
  }
  func.func @transform_4(%arg0: i32, %arg1: i32) -> (i32, i32) {
    %c0_i32 = arith.constant 0 : i32
    %c0_i32_0 = arith.constant 0 : i32
    %c0_i32_1 = arith.constant 0 : i32
    return %c0_i32, %c0_i32_0 : i32, i32
  }
  func.func @transform_5(%arg0: i32, %arg1: i32) -> (i32, i32, i32) {
    %c0_i32 = arith.constant 0 : i32
    %c0_i32_0 = arith.constant 0 : i32
    return %arg0, %c0_i32, %arg1 : i32, i32, i32
  }
}

</mosaic_0001>

<bundles_post_ra>
// kernel: projection_head_forward.1
= control target key start
LH: loop header
LB: loop body
LE: loop exit
PB: predicated region body
PF: predicated region fallthrough
CT: control target
= control target key end

     0   :  { %s889_s18 = smov 0   ;;  %s891_s19 = smov 0   ;;  %s1090_s0 = inlined_call_operand.vmem [shape: f32[2,32,256], index: 0, kind: input, shape index: {}]   ;;  %s1091_s1 = inlined_call_operand.vmem [shape: f32[32,32], index: 1, kind: input, shape index: {}]   ;;  %s1092_s2 = inlined_call_operand.vmem [shape: f32[32,1], index: 2, kind: input, shape index: {}]   ;;  %s1093_s3 = inlined_call_operand.vmem [shape: f32[64,32], index: 3, kind: input, shape index: {}]   ;;  %s1094_s4 = inlined_call_operand.vmem [shape: f32[64,1], index: 4, kind: input, shape index: {}]   ;;  %s1095_s5 = inlined_call_operand.vmem [shape: f32[2,64,256], index: 5, kind: output, shape index: {}]  }
   0x1   :  { %s893_s20 = smov 0  }
   0x2 LB: > { %s27_s21 = sadd.s32 1, %s851_s19  ;;  %p772_p0 = scmp.ge.s32.totalorder %s855_s20, 1  ;;  %s855_s20 = sphi %s893_s20, %s15_s20   ;;  %s851_s19 = sphi %s891_s19, %s1097_s19   ;;  %s847_s18 = sphi %s889_s18, %s1096_s18  }
   0x3   : > { %p29_p1 = scmp.ge.s32.totalorder %s27_s21, 2  ;;  %p208_p2 = scmp.lt.s32.totalorder %s855_s20, 3 }
   0x5   : > { %s1099_s21 = smov (%p29_p1, %s27_s21), 0  ;;  %p209_p3 = pnand %p772_p0, %p208_p2 }
   0x6   : > { %p245_p4 = scmp.lt.s32.totalorder (!%p209_p3), %s847_s18, 1 }
   0x7   : > { %212 = sbr.rel (%p209_p3) target bundleno = 502 (0x1f6), region = 40 }
   0xc   : > { %v857_v0 = vmov 0.0   ;;  %v279_v1 = vld [vmem:[%s1092_s2 + $0x18] sm:$0xff]  ;;  %v277_v2 = vld [vmem:[%s1092_s2 + $0x8] sm:$0xff]  ;;  %s1101_s18 = smov (!%p245_p4, %s847_s18), 1  ;;  %v858_v3 = vmov 0   ;;  %v278_v4 = vld [vmem:[%s1092_s2 + $0x10] sm:$0xff] }
   0xd   : > { %377 = vmatprep.mubr.f32.mxu0 %v857_v0  ;;  %566 = vmatprep.mubr.f32.mxu1 %v857_v0  ;;  %s791_s26 = sshll.u32 %s1101_s18, 6  ;;  %v276_v5 = vld [vmem:[%s1092_s2] sm:$0xff]  ;;  %v419_v13 = vld [vmem:[%s1094_s4 + $0x8] sm:$0xff]  ;;  %vm300_vm0 = vcmask 261120   ;;  %v420_v17 = vld [vmem:[%s1094_s4 + $0x10] sm:$0xff]  ;;  %s792_s7 = sshll.u32 %s1101_s18, 7 }
   0xe   : > { %827 = vset.pattern.permute.xlu0 %v858_v3  ;;  %828 = vset.pattern.permute.xlu1 %v858_v3  ;;  %s252_s6 = scalar_lea.vmem %s1090_s0, %s791_s26  ;;  %v418_v11 = vld [vmem:[%s1094_s4] sm:$0xff]  ;;  %v421_v18 = vld [vmem:[%s1094_s4 + $0x18] sm:$0xff]  ;;  %v265_v19 = vld [vmem:[%s1091_s1 + $0x8] sm:$0xff]  ;;  %s1053_s10 = scalar_lea.vmem %s1095_s5, %s792_s7 }
   0xf   : > { %297 = vperm.xlu0 %827, %v279_v1   ;;  %287 = vperm.xlu1 %828, %v277_v2   ;;  %v275_v6 = vld [vmem:[%s252_s6 + $0x38] sm:$0xff]  ;;  %v274_v7 = vld [vmem:[%s252_s6 + $0x30] sm:$0xff]  ;;  %v273_v8 = vld [vmem:[%s252_s6 + $0x28] sm:$0xff] }
  0x10   : > { %337 = vmatprep.subr.mxu0 %v275_v6  ;;  %v272_v9 = vld [vmem:[%s252_s6 + $0x20] sm:$0xff]  ;;  %v271_v10 = vld [vmem:[%s252_s6 + $0x18] sm:$0xff]  ;;  %v270_v12 = vld [vmem:[%s252_s6 + $0x10] sm:$0xff] }
  0x11   : > { %338 = vmatpush1.msra.mxu0 %v274_v7  ;;  %v269_v14 = vld [vmem:[%s252_s6 + $0x8] sm:$0xff]  ;;  %v268_v15 = vld [vmem:[%s252_s6] sm:$0xff]  ;;  %v266_v22 = vld [vmem:[%s1091_s1 + $0x10] sm:$0xff] }
  0x12   : > { %339 = vmatprep.subr.mxu0 %v273_v8  ;;  %v264_v16 = vld [vmem:[%s1091_s1] sm:$0xff]  ;;  %v423_v21 = vld [vmem:[%s1094_s4 + $0x28] sm:$0xff]  ;;  %v424_v23 = vld [vmem:[%s1094_s4 + $0x30] sm:$0xff] }
  0x13   : > { %292 = vperm.xlu0 %827, %v278_v4   ;;  %282 = vperm.xlu1 %828, %v276_v5   ;;  %v422_v20 = vld [vmem:[%s1094_s4 + $0x20] sm:$0xff]  ;;  %v425_v24 = vld [vmem:[%s1094_s4 + $0x38] sm:$0xff]  ;;  %v412_v55 = vld [vmem:[%s1093_s3 + $0x10] sm:$0xff] }
  0x14   : > { %340 = vmatpush1.msra.mxu0 %v272_v9  ;;  %v267_v25 = vld [vmem:[%s1091_s1 + $0x18] sm:$0xff]  ;;  %v410_v54 = vld [vmem:[%s1093_s3] sm:$0xff]  ;;  %v411_v56 = vld [vmem:[%s1093_s3 + $0x8] sm:$0xff] }
  0x15   : > { %341 = vmatprep.subr.mxu0 %v271_v10  ;;  %v413_v57 = vld [vmem:[%s1093_s3 + $0x18] sm:$0xff]  ;;  %v414_v58 = vld [vmem:[%s1093_s3 + $0x20] sm:$0xff]  ;;  %v415_v59 = vld [vmem:[%s1093_s3 + $0x28] sm:$0xff] }
  0x16   : > { %342 = vmatpush1.msra.mxu0 %v270_v12  ;;  %v416_v60 = vld [vmem:[%s1093_s3 + $0x30] sm:$0xff]  ;;  %v417_v61 = vld [vmem:[%s1093_s3 + $0x38] sm:$0xff] }
  0x17   : > { %428 = vperm.xlu0 %827, %v418_v11   ;;  %433 = vperm.xlu1 %828, %v419_v13  }
  0x18   : > { %343 = vmatprep.subr.mxu0 %v269_v14 }
  0x19   : > { %344 = vmatpush1.msra.mxu0 %v268_v15 }
  0x1a   : > { %777 = vmatmul.mubr.msk.f32.vlgmr.msra.gmra.mxu0 %vm300_vm0, %v264_v16 }
  0x1b   : > { %438 = vperm.xlu0 %827, %v420_v17   ;;  %383 = vmatprep.mubr.f32.mxu0 %v857_v0 }
  0x1c   : > { %443 = vperm.xlu1 %828, %v421_v18  }
  0x1e   : > { %778 = vmatmul.mubr.msk.f32.gmra.mxu0 %vm300_vm0, %v265_v19 }
  0x1f   : > { %448 = vperm.xlu0 %827, %v422_v20   ;;  %389 = vmatprep.mubr.f32.mxu0 %v857_v0 }
  0x20   : > { %453 = vperm.xlu1 %828, %v423_v21  }
  0x22   : > { %779 = vmatmul.mubr.msk.f32.gmra.mxu0 %vm300_vm0, %v266_v22 }
  0x23   : > { %458 = vperm.xlu0 %827, %v424_v23   ;;  %395 = vmatprep.mubr.f32.mxu0 %v857_v0 }
  0x24   : > { %463 = vperm.xlu1 %828, %v425_v24  }
  0x26   : > { %780 = vmatmul.mubr.msk.f32.gmra.mxu0 %vm300_vm0, %v267_v25 }
  0x27   : > { %554 = vmatprep.mubr.f32.mxu0 %v857_v0 }
  0x8a   : > { %v298_v30 = vpop.permute.xlu0 %297  ;;  %v288_v33 = vpop.permute.xlu1 %287 }
  0x8e   : > { %v293_v35 = vpop.permute.xlu0 %292  ;;  %v283_v41 = vpop.permute.xlu1 %282 }
  0x92   : > { %v429_v62 = vpop.permute.xlu0 %428  ;;  %v434_v63 = vpop.permute.xlu1 %433 }
  0x96   : > { %v439_v5 = vpop.permute.xlu0 %438 }
  0x97   : > { %v444_v9 = vpop.permute.xlu1 %443 }
  0x9a   : > { %v449_v25 = vpop.permute.xlu0 %448 }
  0xda   : > { %v379_v26 = vpop.f32.mrf.mxu0 }
  0xdb   : > { %v380_v48 = vadd.f32 %v379_v26, %v283_v41 }
  0xdc   : > { %v381_v27 = vpop.f32.mrf.mxu0 }
  0xdd   : > { %v382_v46 = vadd.f32 %v381_v27, %v283_v41  ;;  %v402_v53 = vmax.f32 %v380_v48, 0.0 }
  0xde   : > { %v385_v28 = vpop.f32.mrf.mxu0 }
  0xdf   : > { %v386_v44 = vadd.f32 %v385_v28, %v288_v33  ;;  %v403_v52 = vmax.f32 %v382_v46, 0.0 }
  0xe0   : > { %v387_v29 = vpop.f32.mrf.mxu0 }
  0xe1   : > { %v388_v42 = vadd.f32 %v387_v29, %v288_v33  ;;  %v404_v51 = vmax.f32 %v386_v44, 0.0 }
  0xe2   : > { %v391_v31 = vpop.f32.mrf.mxu0 }
  0xe3   : > { %v392_v40 = vadd.f32 %v391_v31, %v293_v35  ;;  %v405_v50 = vmax.f32 %v388_v42, 0.0 }
  0xe4   : > { %v393_v32 = vpop.f32.mrf.mxu0 }
  0xe5   : > { %v394_v38 = vadd.f32 %v393_v32, %v293_v35  ;;  %v406_v49 = vmax.f32 %v392_v40, 0.0  ;;  %v454_v32 = vpop.permute.xlu1 %453 }
  0xe6   : > { %v397_v34 = vpop.f32.mrf.mxu0 }
  0xe7   : > { %v398_v36 = vadd.f32 %v397_v34, %v298_v30  ;;  %v407_v47 = vmax.f32 %v394_v38, 0.0 }
  0xe8   : > { %v399_v37 = vpop.f32.mrf.mxu0 }
  0xe9   : > { %v400_v39 = vadd.f32 %v399_v37, %v298_v30  ;;  %v408_v45 = vmax.f32 %v398_v36, 0.0 }
  0xeb   : > { %v409_v43 = vmax.f32 %v400_v39, 0.0 }
  0xed   : > { %514 = vmatprep.subr.mxu0 %v409_v43  ;;  %793 = vmatprep.subr.mxu1 %v409_v43  ;;  %v459_v43 = vpop.permute.xlu0 %458 }
  0xee   : > { %515 = vmatpush1.msra.mxu0 %v408_v45  ;;  %797 = vmatpush1.msra.mxu1 %v408_v45 }
  0xef   : > { %516 = vmatprep.subr.mxu0 %v407_v47  ;;  %794 = vmatprep.subr.mxu1 %v407_v47 }
  0xf0   : > { %517 = vmatpush1.msra.mxu0 %v406_v49  ;;  %798 = vmatpush1.msra.mxu1 %v406_v49 }
  0xf1   : > { %518 = vmatprep.subr.mxu0 %v405_v50  ;;  %795 = vmatprep.subr.mxu1 %v405_v50 }
  0xf2   : > { %519 = vmatpush1.msra.mxu0 %v404_v51  ;;  %799 = vmatpush1.msra.mxu1 %v404_v51 }
  0xf3   : > { %520 = vmatprep.subr.mxu0 %v403_v52  ;;  %796 = vmatprep.subr.mxu1 %v403_v52 }
  0xf4   : > { %521 = vmatpush1.msra.mxu0 %v402_v53  ;;  %800 = vmatpush1.msra.mxu1 %v402_v53 }
  0xf5   : > { %781 = vmatmul.mubr.msk.f32.vlgmr.msra.gmra.mxu0 %vm300_vm0, %v410_v54  ;;  %783 = vmatmul.mubr.msk.f32.vlgmr.msra.gmra.mxu1 %vm300_vm0, %v412_v55  ;;  %v464_v54 = vpop.permute.xlu1 %463 }
  0xf6   : > { %560 = vmatprep.mubr.f32.mxu0 %v857_v0  ;;  %572 = vmatprep.mubr.f32.mxu1 %v857_v0 }
  0xf9   : > { %782 = vmatmul.mubr.msk.f32.gmra.mxu0 %vm300_vm0, %v411_v56  ;;  %784 = vmatmul.mubr.msk.f32.gmra.mxu1 %vm300_vm0, %v413_v57 }
  0xfa   : > { %578 = vmatprep.mubr.f32.mxu1 %v857_v0 }
  0xfd   : > { %785 = vmatmul.mubr.msk.f32.gmra.mxu1 %vm300_vm0, %v414_v58 }
  0xfe   : > { %584 = vmatprep.mubr.f32.mxu1 %v857_v0 }
 0x101   : > { %786 = vmatmul.mubr.msk.f32.gmra.mxu1 %vm300_vm0, %v415_v59 }
 0x102   : > { %590 = vmatprep.mubr.f32.mxu1 %v857_v0 }
 0x105   : > { %787 = vmatmul.mubr.msk.f32.gmra.mxu1 %vm300_vm0, %v416_v60 }
 0x106   : > { %596 = vmatprep.mubr.f32.mxu1 %v857_v0 }
 0x109   : > { %788 = vmatmul.mubr.msk.f32.gmra.mxu1 %vm300_vm0, %v417_v61 }
 0x1b5   : > { %v556_v1 = vpop.f32.mrf.mxu0  ;;  %v568_v2 = vpop.f32.mrf.mxu1 }
 0x1b6   : > { %v1009_v6 = vadd.f32 %v556_v1, %v429_v62  ;;  %v1011_v10 = vadd.f32 %v568_v2, %v439_v5 }
 0x1b7   : > { %v558_v3 = vpop.f32.mrf.mxu0  ;;  %v570_v4 = vpop.f32.mrf.mxu1 }
 0x1b8   : > { %v1013_v0 = vadd.f32 %v558_v3, %v429_v62  ;;  %v1017_v12 = vadd.f32 %v570_v4, %v439_v5  ;;  %v603_v15 = vmul.f32 %v1009_v6, %v1009_v6  ;;  %v607_v21 = vmul.f32 %v1011_v10, %v1011_v10 }
 0x1b9   : > { %v562_v7 = vpop.f32.mrf.mxu0  ;;  %v574_v8 = vpop.f32.mrf.mxu1 }
 0x1ba   : > { %v1015_v11 = vadd.f32 %v562_v7, %v434_v63  ;;  %v1023_v17 = vadd.f32 %v574_v8, %v444_v9  ;;  %v604_v22 = vmul.f32 %v1013_v0, %v1013_v0  ;;  %v608_v26 = vmul.f32 %v1017_v12, %v1017_v12 }
 0x1bb   : > { %v564_v13 = vpop.f32.mrf.mxu0  ;;  %v576_v14 = vpop.f32.mrf.mxu1 }
 0x1bc   : > { %v605_v16 = vmul.f32 %v1015_v11, %v1015_v11  ;;  %v1025_v18 = vadd.f32 %v564_v13, %v434_v63  ;;  %v1027_v19 = vadd.f32 %v576_v14, %v444_v9  ;;  %v609_v28 = vmul.f32 %v1023_v17, %v1023_v17 }
 0x1bd   : > { %v580_v20 = vpop.f32.mrf.mxu1 }
 0x1be   : > { %v619_v23 = vadd.f32 %v605_v16, %v603_v15  ;;  %v606_v24 = vmul.f32 %v1025_v18, %v1025_v18  ;;  %v581_v31 = vadd.f32 %v580_v20, %v449_v25  ;;  %v610_v33 = vmul.f32 %v1027_v19, %v1027_v19 }
 0x1bf   : > { %v582_v27 = vpop.f32.mrf.mxu1 }
 0x1c0   : > { %v620_v29 = vadd.f32 %v619_v23, %v607_v21  ;;  %v632_v30 = vadd.f32 %v606_v24, %v604_v22  ;;  %v1041_v37 = vadd.f32 %v582_v27, %v449_v25  ;;  %v611_v41 = vmul.f32 %v581_v31, %v581_v31 }
 0x1c1   : > { %v586_v34 = vpop.f32.mrf.mxu1 }
 0x1c2   : > { %v621_v35 = vadd.f32 %v620_v29, %v609_v28  ;;  %v633_v36 = vadd.f32 %v632_v30, %v608_v26  ;;  %v587_v38 = vadd.f32 %v586_v34, %v454_v32  ;;  %v612_v46 = vmul.f32 %v1041_v37, %v1041_v37 }
 0x1c3   : > { %v588_v39 = vpop.f32.mrf.mxu1 }
 0x1c4   : > { %v634_v40 = vadd.f32 %v633_v36, %v610_v33  ;;  %v1043_v42 = vadd.f32 %v588_v39, %v454_v32  ;;  %v622_v45 = vadd.f32 %v621_v35, %v611_v41  ;;  %v613_v47 = vmul.f32 %v587_v38, %v587_v38 }
 0x1c5   : > { %v592_v44 = vpop.f32.mrf.mxu1 }
 0x1c6   : > { %v593_v48 = vadd.f32 %v592_v44, %v459_v43  ;;  %v635_v50 = vadd.f32 %v634_v40, %v612_v46  ;;  %v614_v51 = vmul.f32 %v1043_v42, %v1043_v42  ;;  %v623_v56 = vadd.f32 %v622_v45, %v613_v47 }
 0x1c7   : > { %v594_v49 = vpop.f32.mrf.mxu1 }
 0x1c8   : > { %v615_v52 = vmul.f32 %v593_v48, %v593_v48  ;;  %v595_v53 = vadd.f32 %v594_v49, %v459_v43  ;;  %v636_v60 = vadd.f32 %v635_v50, %v614_v51 }
 0x1c9   : > { %v598_v55 = vpop.f32.mrf.mxu1 }
 0x1ca   : > { %v616_v57 = vmul.f32 %v595_v53, %v595_v53  ;;  %v599_v58 = vadd.f32 %v598_v55, %v464_v54  ;;  %v624_v61 = vadd.f32 %v623_v56, %v615_v52 }
 0x1cb   : > { %v600_v59 = vpop.f32.mrf.mxu1 }
 0x1cc   : > { %v617_v62 = vmul.f32 %v599_v58, %v599_v58  ;;  %v601_v63 = vadd.f32 %v600_v59, %v464_v54  ;;  %v637_v1 = vadd.f32 %v636_v60, %v616_v57 }
 0x1ce   : > { %v625_v2 = vadd.f32 %v624_v61, %v617_v62  ;;  %v618_v3 = vmul.f32 %v601_v63, %v601_v63 }
 0x1d0   : > { %v626_v4 = vrot.slane %v625_v2, 4  ;;  %v638_v5 = vadd.f32 %v637_v1, %v618_v3 }
 0x1d2   : > { %v627_v7 = vadd.f32 %v626_v4, %v625_v2  ;;  %v639_v8 = vrot.slane %v638_v5, 4 }
 0x1d4   : > { %v628_v9 = vrot.slane %v627_v7, 2  ;;  %v640_v13 = vadd.f32 %v639_v8, %v638_v5 }
 0x1d6   : > { %v629_v14 = vadd.f32 %v628_v9, %v627_v7  ;;  %v641_v15 = vrot.slane %v640_v13, 2 }
 0x1d8   : > { %v630_v16 = vrot.slane %v629_v14, 1  ;;  %v642_v20 = vadd.f32 %v641_v15, %v640_v13 }
 0x1da   : > { %v631_v21 = vadd.f32 %v630_v16, %v629_v14  ;;  %v643_v22 = vrot.slane %v642_v20, 1 }
 0x1dc   : > { %v645_v23 = vmax.f32 %v631_v21, 1e-24  ;;  %v644_v24 = vadd.f32 %v643_v22, %v642_v20 }
 0x1de   : > { %829 = vrsqrt.f32 %v645_v23  ;;  %v646_v25 = vmax.f32 %v644_v24, 1e-24 }
 0x1e0   : > { %831 = vrsqrt.f32 %v646_v25 }
 0x1eb   : > { %v830_v26 = vpop.eup %829 }
 0x1ec   : > { %v649_v27 = vmul.f32 %v830_v26, %v1009_v6  ;;  %v651_v28 = vmul.f32 %v830_v26, %v1015_v11  ;;  %v653_v29 = vmul.f32 %v830_v26, %v1011_v10  ;;  %v655_v30 = vmul.f32 %v830_v26, %v1023_v17 }
 0x1ed   : > { %v832_v32 = vpop.eup %831  ;;  %v657_v33 = vmul.f32 %v830_v26, %v581_v31  ;;  %v659_v34 = vmul.f32 %v830_v26, %v587_v38  ;;  %v661_v35 = vmul.f32 %v830_v26, %v593_v48  ;;  %v663_v36 = vmul.f32 %v830_v26, %v599_v58 }
 0x1ee   : > { %665 = vst [vmem:[%s1053_s10] sm:$0xff] %v649_v27  ;;  %667 = vst [vmem:[%s1053_s10 + $0x10] sm:$0xff] %v651_v28  ;;  %v650_v6 = vmul.f32 %v832_v32, %v1013_v0  ;;  %v652_v10 = vmul.f32 %v832_v32, %v1025_v18  ;;  %v654_v11 = vmul.f32 %v832_v32, %v1017_v12 }
 0x1ef   : > { %669 = vst [vmem:[%s1053_s10 + $0x20] sm:$0xff] %v653_v29  ;;  %671 = vst [vmem:[%s1053_s10 + $0x30] sm:$0xff] %v655_v30  ;;  %v656_v17 = vmul.f32 %v832_v32, %v1027_v19  ;;  %v658_v31 = vmul.f32 %v832_v32, %v1041_v37  ;;  %v660_v38 = vmul.f32 %v832_v32, %v1043_v42 }
 0x1f0   : > { %673 = vst [vmem:[%s1053_s10 + $0x40] sm:$0xff] %v657_v33  ;;  %675 = vst [vmem:[%s1053_s10 + $0x50] sm:$0xff] %v659_v34  ;;  %v662_v39 = vmul.f32 %v832_v32, %v595_v53  ;;  %v664_v0 = vmul.f32 %v832_v32, %v601_v63 }
 0x1f1   : > { %677 = vst [vmem:[%s1053_s10 + $0x60] sm:$0xff] %v661_v35  ;;  %679 = vst [vmem:[%s1053_s10 + $0x70] sm:$0xff] %v663_v36 }
 0x1f2   : > { %666 = vst [vmem:[%s1053_s10 + $0x8] sm:$0xff] %v650_v6  ;;  %668 = vst [vmem:[%s1053_s10 + $0x18] sm:$0xff] %v652_v10 }
 0x1f3   : > { %670 = vst [vmem:[%s1053_s10 + $0x28] sm:$0xff] %v654_v11  ;;  %672 = vst [vmem:[%s1053_s10 + $0x38] sm:$0xff] %v656_v17 }
 0x1f4   : > { %674 = vst [vmem:[%s1053_s10 + $0x48] sm:$0xff] %v658_v31  ;;  %676 = vst [vmem:[%s1053_s10 + $0x58] sm:$0xff] %v660_v38 }
 0x1f5   : > { %678 = vst [vmem:[%s1053_s10 + $0x68] sm:$0xff] %v662_v39  ;;  %680 = vst [vmem:[%s1053_s10 + $0x78] sm:$0xff] %v664_v0 }
 0x1f6 PF: > { %s15_s20 = sadd.s32 1, %s855_s20   ;;  %s1096_s18 = smov %s851_s19 }
 0x1f7   : > { %p12_p5 = scmp.ge.s32.totalorder %s15_s20, 4   ;;  %s1097_s19 = smov %s1099_s21 }
 0x1f9   :  { %14 = sbr.rel (!%p12_p5) target bundleno = 2 (0x2), region = 70 }

</bundles_post_ra>
